<compile_context>
chip_gen: v7x
topology: tpu7x:2x2x1
jax: 0.10.0
libtpu: 0.0.40
codegen_flags: <defaults>
</compile_context>

<pallas_src>
import numpy as np
import jax
import jax.numpy as jnp
from jax.experimental import pallas as pl
from jax.experimental.pallas import tpu as pltpu


def _round_up(x, m):
    return ((x + m - 1) // m) * m


def _vmem_budget():
    """(double-buffered working-set budget, vmem_limit_bytes) for this chip."""
    try:
        cap = int(pltpu.get_tpu_info().vmem_capacity_bytes)
    except Exception:  # off-TPU tracing / older runtimes: assume smallest (v7x-like)
        cap = 64 * 1024 * 1024
    budget = min(max(cap // 4, 8 * 1024 * 1024), 32 * 1024 * 1024)
    limit = min(max((cap * 3) // 4, 32 * 1024 * 1024), 96 * 1024 * 1024)
    return budget, limit


def _pick_tiles(B, K, M, l_isz, w_isz, o_isz, budget):
    """Pick (TB, TM): batch rows / flattened-tensor lanes per grid step."""

    def sub(isz):
        # Sublane tile height for a dtype: 8 for f32, 16 for bf16, 32 for int8/fp8.
        return max(8, 32 // max(int(isz), 1))

    kp_l = _round_up(max(K, 1), sub(l_isz))
    kp_w = _round_up(max(K, 1), sub(w_isz))
    op = sub(o_isz)

    def blk_bytes(tb, tm):
        tmp = _round_up(tm, 128)
        l_b = tb * kp_l * tmp * l_isz          # L block  (TB, K, TM)
        w_b = tb * kp_w * 128 * w_isz          # w block  (TB, K, 1) -> 128 lanes padded
        o_b = tb * op * tmp * o_isz            # out block (TB, 1, TM)
        return 2 * (l_b + w_b + o_b)           # double-buffered

    tb = B
    if B >= 16:
        # Guarantee >= 2 batch blocks so both v7x TensorCores (and their DMA
        # queues) stay busy; the ~0.35 us extra grid step is negligible.
        tb = min(tb, _round_up(pl.cdiv(B, 2), 8))
    tb = min(tb, 256)

    if blk_bytes(tb, M) <= budget:
        tm = M                                  # full dim: always a legal block
    else:
        # Lane-dense tiling: multiples of 128, only the last block ragged.
        tm = max(128, (M // 128) * 128)
        while tm > 128 and blk_bytes(tb, tm) > budget:
            tm = max(128, ((tm // 2) // 128) * 128)
    while tb > 8 and blk_bytes(tb, tm) > budget:
        tb = max(8, tb // 2)

    # TODO(synk): for very large K (K*128-lane blocks exceeding VMEM) add a
    # K-reduction grid axis ("arbitrary", innermost) with a VMEM accumulator;
    # K (number of structural generators) is tiny in practice.
    return tb, max(1, tm)


def _lgen_kernel(w_ref, l_ref, o_ref):
    # w_ref: (TB, K, 1)   per-batch generator weights (K on sublanes)
    # l_ref: (TB, K, TM)  K flattened structural tensors per batch row
    # o_ref: (TB, 1, TM)  weighted sum (flattened)
    w = w_ref[...].astype(jnp.float32)
    L = l_ref[...].astype(jnp.float32)
    # Fused broadcast-multiply + sublane (K-axis) reduction: each L vreg is
    # read once; the reduction goes to the XLU slot and the accumulate stays
    # inside vregs (no VMEM round-trips of a separate accumulator).
    o_ref[...] = jnp.sum(w * L, axis=1, keepdims=True).astype(o_ref.dtype)


def generalized_structural_tensor(L_, w_, *, force_pallas=False):
    """JAX/Pallas equivalent of GeneralizedStructuralTensorComputer.forward.

    L_: (B, K, D1, D2, ...) structural tensors (any trailing rank)
    w_: (B, K)              generator weights
    returns (B, D1, D2, ...)
    """
    B, K = w_.shape
    assert L_.shape[:2] == (B, K), "leading (batch, generator) dims must match"
    tensor_shape = tuple(L_.shape[2:])
    M = int(np.prod(tensor_shape)) if tensor_shape else 1
    out_dtype = jnp.result_type(L_.dtype, w_.dtype)

    if K == 0:
        return jnp.zeros((B,) + tensor_shape, out_dtype)

    l_isz = jnp.dtype(L_.dtype).itemsize
    w_isz = jnp.dtype(w_.dtype).itemsize
    o_isz = jnp.dtype(out_dtype).itemsize

    # NOTE: this reshape is free only if L_ is row-major contiguous; an
    # upstream transpose would make XLA insert an HBM copy.
    L_flat = L_.reshape(B, K, M)

    # Small-problem fast path: at these sizes the Pallas kernel is pure launch
    # + grid-step overhead with masked partial stores; plain XLA is as fast.
    total_bytes = B * K * M * l_isz + B * K * w_isz
    if total_bytes < (2 << 20) and not force_pallas:
        out_flat = jnp.einsum("bk,bkm->bm", w_, L_flat).astype(out_dtype)
        return out_flat.reshape((B,) + tensor_shape)

    budget, vmem_limit = _vmem_budget()
    TB, TM = _pick_tiles(B, K, M, l_isz, w_isz, o_isz, budget)
    nb = pl.cdiv(B, TB)
    nm = pl.cdiv(M, TM)

    w3 = w_.reshape(B, K, 1)  # K on sublanes, matching L's layout

    cost = pl.CostEstimate(
        flops=2 * B * K * M,
        transcendentals=0,
        bytes_accessed=(B * K * M * l_isz + B * K * w_isz + B * M * o_isz),
    )

    out_flat = pl.pallas_call(
        _lgen_kernel,
        out_shape=jax.ShapeDtypeStruct((B, 1, M), out_dtype),
        grid=(nb, nm),
        in_specs=[
            pl.BlockSpec((TB, K, 1), lambda b, m: (b, 0, 0)),   # w tile
            pl.BlockSpec((TB, K, TM), lambda b, m: (b, 0, m)),  # L tile
        ],
        out_specs=pl.BlockSpec((TB, 1, TM), lambda b, m: (b, 0, m)),
        compiler_params=pltpu.CompilerParams(
            dimension_semantics=("parallel", "parallel"),
            vmem_limit_bytes=vmem_limit,
        ),
        cost_estimate=cost,
    )(w3, L_flat)

    return out_flat.reshape((B,) + tensor_shape)


if __name__ == "__main__":
    key = jax.random.PRNGKey(0)
    k1, k2, k3, k4, k5, k6 = jax.random.split(key, 6)

    # Case 1: the module's real use case (3x3 structural tensors) — einsum fast path.
    B, K, D = 2, 4, 3
    L_ = jax.random.normal(k1, (B, K, D, D), dtype=jnp.float32)
    w_ = jax.random.normal(k2, (B, K), dtype=jnp.float32)
    out = jax.block_until_ready(generalized_structural_tensor(L_, w_))
    ref = jnp.einsum("bk,bkij->bij", w_, L_)
    assert out.shape == (B, D, D)
    np.testing.assert_allclose(np.asarray(out), np.asarray(ref), rtol=1e-5, atol=1e-5)

    # Case 2: Pallas path, f32, multi-block batch tiling, ragged lane tile (M=12).
    B2, K2, D1, D2 = 16, 3, 3, 4
    L2 = jax.random.normal(k3, (B2, K2, D1, D2), dtype=jnp.float32)
    w2 = jax.random.normal(k4, (B2, K2), dtype=jnp.float32)
    out2 = jax.block_until_ready(
        generalized_structural_tensor(L2, w2, force_pallas=True))
    ref2 = jnp.einsum("bk,bkij->bij", w2, L2)
    np.testing.assert_allclose(np.asarray(out2), np.asarray(ref2),
                               rtol=1e-5, atol=1e-5)

    # Case 3: Pallas path, bf16 inputs with f32 in-kernel accumulation (M=256).
    B3, K3, D3a, D3b = 8, 4, 8, 32
    L3 = jax.random.normal(k5, (B3, K3, D3a, D3b), dtype=jnp.float32).astype(jnp.bfloat16)
    w3 = jax.random.normal(k6, (B3, K3), dtype=jnp.float32).astype(jnp.bfloat16)
    out3 = jax.block_until_ready(
        generalized_structural_tensor(L3, w3, force_pallas=True))
    ref3 = jnp.einsum("bk,bkij->bij",
                      w3.astype(jnp.float32), L3.astype(jnp.float32)).astype(jnp.bfloat16)
    np.testing.assert_allclose(np.asarray(out3.astype(jnp.float32)),
                               np.asarray(ref3.astype(jnp.float32)),
                               rtol=2e-2, atol=2e-2)

    print("KERNEL_OK")
</pallas_src>

<mosaic_0001>
module attributes {stable_mosaic.version = 11 : i64} {
  func.func @_lgen_kernel(%arg0: i32, %arg1: i32, %arg2: memref<8x3x1xf32, #tpu.memory_space<vmem>>, %arg3: memref<8x3x12xf32, #tpu.memory_space<vmem>>, %arg4: memref<8x1x12xf32, #tpu.memory_space<vmem>>) attributes {dimension_semantics = [#tpu.dimension_semantics<parallel>, #tpu.dimension_semantics<parallel>], iteration_bounds = array<i64: 2, 1>, scalar_prefetch = 0 : i64, scratch_operands = 0 : i64, tpu.core_type = #tpu.core_type<tc>, window_params = [{transform_indices = @transform_0, window_bounds = array<i64: 8, 3, 1>}, {transform_indices = @transform_1, window_bounds = array<i64: 8, 3, 12>}, {transform_indices = @transform_2, window_bounds = array<i64: 8, 1, 12>}]} {
    %c0 = arith.constant 0 : index
    %c0_0 = arith.constant 0 : index
    %c0_1 = arith.constant 0 : index
    %0 = vector.load %arg2[%c0, %c0_0, %c0_1] : memref<8x3x1xf32, #tpu.memory_space<vmem>>, vector<8x3x1xf32>
    %c0_2 = arith.constant 0 : index
    %c0_3 = arith.constant 0 : index
    %c0_4 = arith.constant 0 : index
    %1 = vector.load %arg3[%c0_2, %c0_3, %c0_4] : memref<8x3x12xf32, #tpu.memory_space<vmem>>, vector<8x3x12xf32>
    %2 = vector.broadcast %0 : vector<8x3x1xf32> to vector<8x3x12xf32>
    %3 = arith.mulf %2, %1 : vector<8x3x12xf32>
    %cst = arith.constant dense<0.000000e+00> : vector<8x12xf32>
    %4 = vector.multi_reduction <add>, %3, %cst [1] : vector<8x3x12xf32> to vector<8x12xf32>
    %5 = vector.shape_cast %4 : vector<8x12xf32> to vector<8x1x12xf32>
    %c0_5 = arith.constant 0 : index
    %c0_6 = arith.constant 0 : index
    %c0_7 = arith.constant 0 : index
    %6 = vector.load %arg4[%c0_5, %c0_6, %c0_7] : memref<8x1x12xf32, #tpu.memory_space<vmem>>, vector<8x1x12xf32>
    tpu.vector_store %arg4[%c0_5, %c0_6, %c0_7], %5 {strides = array<i32>} : memref<8x1x12xf32, #tpu.memory_space<vmem>>, vector<8x1x12xf32>,
    return
  }
  func.func @transform_0(%arg0: i32, %arg1: i32) -> (i32, i32, i32) {
    %c0_i32 = arith.constant 0 : i32
    %c0_i32_0 = arith.constant 0 : i32
    %c0_i32_1 = arith.constant 0 : i32
    return %arg0, %c0_i32, %c0_i32_0 : i32, i32, i32
  }
  func.func @transform_1(%arg0: i32, %arg1: i32) -> (i32, i32, i32) {
    %c0_i32 = arith.constant 0 : i32
    %c0_i32_0 = arith.constant 0 : i32
    return %arg0, %c0_i32, %arg1 : i32, i32, i32
  }
  func.func @transform_2(%arg0: i32, %arg1: i32) -> (i32, i32, i32) {
    %c0_i32 = arith.constant 0 : i32
    %c0_i32_0 = arith.constant 0 : i32
    return %arg0, %c0_i32, %arg1 : i32, i32, i32
  }
}

</mosaic_0001>

<bundles_post_ra>
// kernel: tpu_custom_call.1
= control target key start
LH: loop header
LB: loop body
LE: loop exit
PB: predicated region body
PF: predicated region fallthrough
CT: control target
= control target key end

     0   :  { %s491_s9 = smov 0   ;;  %s493_s10 = smov 0   ;;  %s567_s0 = inlined_call_operand.vmem [shape: f32[16,3,1], index: 0, kind: input, shape index: {}]   ;;  %s568_s1 = inlined_call_operand.vmem [shape: f32[16,3,12], index: 1, kind: input, shape index: {}]   ;;  %s569_s2 = inlined_call_operand.vmem [shape: f32[16,1,12], index: 2, kind: output, shape index: {}]  }
   0x1   :  { %s495_s11 = smov 0  }
   0x2 LB: > { %s24_s12 = sadd.s32 1, %s469_s10  ;;  %p416_p0 = scmp.ge.s32.totalorder %s473_s11, 1  ;;  %s473_s11 = sphi %s495_s11, %s12_s11   ;;  %s469_s10 = sphi %s493_s10, %s571_s10   ;;  %s465_s9 = sphi %s491_s9, %s570_s9  }
   0x3   : > { %p26_p1 = scmp.ge.s32.totalorder %s24_s12, 2  ;;  %p143_p2 = scmp.lt.s32.totalorder %s473_s11, 3 }
   0x5   : > { %s573_s12 = smov (%p26_p1, %s24_s12), 0  ;;  %p144_p3 = pnand %p416_p0, %p143_p2 }
   0x6   : > { %s417_s13 = sshll.u32 (!%p144_p3), %s465_s9, 3  ;;  %v475_v0 = vmov (!%p144_p3), 0   ;;  %vm262_vm0 = vcmask (!%p144_p3), 92160   ;;  %vm319_vm1 = vcmask (!%p144_p3), 90112  }
   0x7   : > { %147 = sbr.rel (%p144_p3) target bundleno = 175 (0xaf), region = 28  ;;  %450 = vset.pattern.permute.xlu1 (!%p144_p3), %v475_v0  ;;  %449 = vset.pattern.permute.xlu0 (!%p144_p3), %v475_v0  ;;  %p176_p4 = scmp.lt.s32.totalorder (!%p144_p3), %s417_s13, 15 }
   0xe   : > { %s575_s13 = smov (!%p176_p4, %s417_s13), 15 }
   0xf   : > { %s418_s14 = sshll.u32 %s575_s13, 2  ;;  %s538_s23 = scalar_lea.vmem %s569_s2, %s575_s13 }
  0x10   : > { %s179_s17 = scalar_lea.vmem %s567_s0, %s418_s14  ;;  %s518_s20 = scalar_lea.vmem %s568_s1, %s418_s14 }
  0x11   : > { %v200_v1 = vld [vmem:[%s179_s17 + $0x8] sm:$0x7]  ;;  %v198_v2 = vld [vmem:[%s179_s17] sm:$0x7]  ;;  %v201_v3 = vld [vmem:[%s179_s17 + $0xc] sm:$0x7] }
  0x12   : > { %226 = vperm.xlu1 %450, %v200_v1   ;;  %216 = vperm.xlu0 %449, %v198_v2   ;;  %v199_v4 = vld [vmem:[%s179_s17 + $0x4] sm:$0x7]  ;;  %v203_v5 = vld [vmem:[%s179_s17 + $0x14] sm:$0x7]  ;;  %v202_v6 = vld [vmem:[%s179_s17 + $0x10] sm:$0x7] }
  0x13   : > { %v205_v7 = vld [vmem:[%s179_s17 + $0x1c] sm:$0x7]  ;;  %v204_v8 = vld [vmem:[%s179_s17 + $0x18] sm:$0x7]  ;;  %v208_v9 = vld [vmem:[%s518_s20 + $0x8] sm:$0x7] }
  0x14   : > { %v206_v10 = vld [vmem:[%s518_s20] sm:$0x7]  ;;  %v209_v15 = vld [vmem:[%s518_s20 + $0xc] sm:$0x7]  ;;  %v207_v16 = vld [vmem:[%s518_s20 + $0x4] sm:$0x7] }
  0x15   : > { %v211_v27 = vld [vmem:[%s518_s20 + $0x14] sm:$0x7]  ;;  %v210_v28 = vld [vmem:[%s518_s20 + $0x10] sm:$0x7]  ;;  %v213_v43 = vld [vmem:[%s518_s20 + $0x1c] sm:$0x7] }
  0x16   : > { %231 = vperm.xlu1 %450, %v201_v3   ;;  %221 = vperm.xlu0 %449, %v199_v4   ;;  %v212_v44 = vld [vmem:[%s518_s20 + $0x18] sm:$0x7] }
  0x1a   : > { %241 = vperm.xlu1 %450, %v203_v5   ;;  %236 = vperm.xlu0 %449, %v202_v6  }
  0x1e   : > { %251 = vperm.xlu1 %450, %v205_v7   ;;  %246 = vperm.xlu0 %449, %v204_v8  }
  0x91   : > { %v227_v11 = vpop.permute.xlu1 %226  ;;  %v217_v12 = vpop.permute.xlu0 %216 }
  0x92   : > { %v256_v13 = vmul.f32 %v227_v11, %v208_v9  ;;  %v254_v14 = vmul.f32 %v217_v12, %v206_v10 }
  0x94   : > { %v277_v17 = vsel %vm262_vm0, %v256_v13, 0.0  ;;  %v263_v18 = vsel %vm262_vm0, %v254_v14, 0.0 }
  0x95   : > { %v278_v19 = vrot.slane %v277_v17, 4  ;;  %v264_v20 = vrot.slane %v263_v18, 4  ;;  %v232_v21 = vpop.permute.xlu1 %231  ;;  %v222_v22 = vpop.permute.xlu0 %221 }
  0x96   : > { %v257_v23 = vmul.f32 %v232_v21, %v209_v15  ;;  %v255_v24 = vmul.f32 %v222_v22, %v207_v16 }
  0x97   : > { %v279_v25 = vadd.f32 %v278_v19, %v277_v17  ;;  %v265_v26 = vadd.f32 %v264_v20, %v263_v18 }
  0x98   : > { %v284_v29 = vsel %vm262_vm0, %v257_v23, 0.0  ;;  %v270_v30 = vsel %vm262_vm0, %v255_v24, 0.0 }
  0x99   : > { %v280_v31 = vrot.slane %v279_v25, 2  ;;  %v266_v32 = vrot.slane %v265_v26, 2  ;;  %v285_v33 = vrot.slane %v284_v29, 4  ;;  %v271_v34 = vrot.slane %v270_v30, 4  ;;  %v242_v35 = vpop.permute.xlu1 %241  ;;  %v237_v36 = vpop.permute.xlu0 %236 }
  0x9a   : > { %v259_v37 = vmul.f32 %v242_v35, %v211_v27  ;;  %v258_v38 = vmul.f32 %v237_v36, %v210_v28 }
  0x9b   : > { %v281_v39 = vadd.f32 %v280_v31, %v279_v25  ;;  %v267_v40 = vadd.f32 %v266_v32, %v265_v26  ;;  %v286_v41 = vadd.f32 %v285_v33, %v284_v29  ;;  %v272_v42 = vadd.f32 %v271_v34, %v270_v30 }
  0x9c   : > { %v298_v45 = vsel %vm262_vm0, %v259_v37, 0.0  ;;  %v291_v46 = vsel %vm262_vm0, %v258_v38, 0.0 }
  0x9d   : > { %v282_v47 = vrot.slane %v281_v39, 1  ;;  %v268_v48 = vrot.slane %v267_v40, 1  ;;  %v287_v49 = vrot.slane %v286_v41, 2  ;;  %v273_v50 = vrot.slane %v272_v42, 2  ;;  %v252_v51 = vpop.permute.xlu1 %251  ;;  %v247_v52 = vpop.permute.xlu0 %246 }
  0x9e   : > { %v299_v53 = vrot.slane %v298_v45, 4  ;;  %v292_v54 = vrot.slane %v291_v46, 4  ;;  %v261_v55 = vmul.f32 %v252_v51, %v213_v43  ;;  %v260_v56 = vmul.f32 %v247_v52, %v212_v44 }
  0x9f   : > { %v283_v57 = vadd.f32 %v282_v47, %v281_v39  ;;  %v269_v58 = vadd.f32 %v268_v48, %v267_v40  ;;  %v288_v59 = vadd.f32 %v287_v49, %v286_v41  ;;  %v274_v60 = vadd.f32 %v273_v50, %v272_v42 }
  0xa0   : > { %v300_v61 = vadd.f32 %v299_v53, %v298_v45  ;;  %v293_v62 = vadd.f32 %v292_v54, %v291_v46  ;;  %v312_v63 = vsel %vm262_vm0, %v261_v55, 0.0  ;;  %v305_v0 = vsel %vm262_vm0, %v260_v56, 0.0 }
  0xa1   : > { %322 = vst.msk [vmem:[%s538_s23 + $0x2] sm:$0x1] %vm319_vm1, %v283_v57  ;;  %320 = vst.msk [vmem:[%s538_s23] sm:$0x1] %vm319_vm1, %v269_v58  ;;  %v289_v1 = vrot.slane %v288_v59, 1  ;;  %v275_v2 = vrot.slane %v274_v60, 1 }
  0xa2   : > { %v313_v3 = vrot.slane %v312_v63, 4  ;;  %v306_v4 = vrot.slane %v305_v0, 4  ;;  %v301_v5 = vrot.slane %v300_v61, 2  ;;  %v294_v6 = vrot.slane %v293_v62, 2 }
  0xa3   : > { %v290_v7 = vadd.f32 %v289_v1, %v288_v59  ;;  %v276_v8 = vadd.f32 %v275_v2, %v274_v60 }
  0xa4   : > { %v314_v9 = vadd.f32 %v313_v3, %v312_v63  ;;  %v307_v10 = vadd.f32 %v306_v4, %v305_v0  ;;  %v302_v11 = vadd.f32 %v301_v5, %v300_v61  ;;  %v295_v12 = vadd.f32 %v294_v6, %v293_v62 }
  0xa5   : > { %323 = vst.msk [vmem:[%s538_s23 + $0x3] sm:$0x1] %vm319_vm1, %v290_v7  ;;  %321 = vst.msk [vmem:[%s538_s23 + $0x1] sm:$0x1] %vm319_vm1, %v276_v8 }
  0xa6   : > { %v315_v13 = vrot.slane %v314_v9, 2  ;;  %v308_v14 = vrot.slane %v307_v10, 2  ;;  %v303_v15 = vrot.slane %v302_v11, 1  ;;  %v296_v16 = vrot.slane %v295_v12, 1 }
  0xa8   : > { %v316_v17 = vadd.f32 %v315_v13, %v314_v9  ;;  %v309_v18 = vadd.f32 %v308_v14, %v307_v10  ;;  %v304_v19 = vadd.f32 %v303_v15, %v302_v11  ;;  %v297_v20 = vadd.f32 %v296_v16, %v295_v12 }
  0xaa   : > { %v317_v21 = vrot.slane %v316_v17, 1  ;;  %v310_v22 = vrot.slane %v309_v18, 1  ;;  %325 = vst.msk [vmem:[%s538_s23 + $0x5] sm:$0x1] %vm319_vm1, %v304_v19  ;;  %324 = vst.msk [vmem:[%s538_s23 + $0x4] sm:$0x1] %vm319_vm1, %v297_v20 }
  0xac   : > { %v318_v23 = vadd.f32 %v317_v21, %v316_v17  ;;  %v311_v24 = vadd.f32 %v310_v22, %v309_v18 }
  0xae   : > { %327 = vst.msk [vmem:[%s538_s23 + $0x7] sm:$0x1] %vm319_vm1, %v318_v23  ;;  %326 = vst.msk [vmem:[%s538_s23 + $0x6] sm:$0x1] %vm319_vm1, %v311_v24 }
  0xaf PF: > { %s12_s11 = sadd.s32 1, %s473_s11   ;;  %s570_s9 = smov %s469_s10 }
  0xb0   : > { %p9_p5 = scmp.ge.s32.totalorder %s12_s11, 4   ;;  %s571_s10 = smov %s573_s12 }
  0xb2   :  { %11 = sbr.rel (!%p9_p5) target bundleno = 2 (0x2), region = 61 }

</bundles_post_ra>
